<compile_context>
chip_gen: v5e
topology: v5e:2x2
jax: 0.10.0
libtpu: 0.0.40
codegen_flags: <defaults>
</compile_context>

<pallas_src>
import functools

import jax
import jax.numpy as jnp
from jax.experimental import pallas as pl
from jax.experimental.pallas import tpu as pltpu

INPUT_LAYER = 32
HIDDEN_LAYERS = (64, 64, 32)
OUTPUT_LAYER = 16

PAD = 128            # every feature dim padded up to one full 128-lane tile
DEFAULT_TILE_B = 256  # batch rows per grid step (multiple of 8)


def _dqn_kernel(x_ref,
                w1_ref, b1_ref,
                w2_ref, b2_ref,
                w3_ref, b3_ref,
                w4_ref, b4_ref,
                out_ref):
    """Fused padded 4-layer MLP on one [TILE_B, 128] activation tile.

    x_ref / w*_ref are bf16; all matmuls accumulate in f32 on the MXU;
    bias-add and ReLU run in f32 on the VPU.
    """
    h = jnp.dot(x_ref[...], w1_ref[...],
                preferred_element_type=jnp.float32) + b1_ref[...]
    h = jnp.maximum(h, 0.0)

    h = jnp.dot(h.astype(jnp.bfloat16), w2_ref[...],
                preferred_element_type=jnp.float32) + b2_ref[...]
    h = jnp.maximum(h, 0.0)

    h = jnp.dot(h.astype(jnp.bfloat16), w3_ref[...],
                preferred_element_type=jnp.float32) + b3_ref[...]
    h = jnp.maximum(h, 0.0)

    h = jnp.dot(h.astype(jnp.bfloat16), w4_ref[...],
                preferred_element_type=jnp.float32) + b4_ref[...]

    out_ref[...] = h.astype(out_ref.dtype)


def _round_up(n, m):
    return ((n + m - 1) // m) * m


def _pad_weight(w_torch_layout):
    """PyTorch (out, in) weight -> zero-padded (PAD, PAD) bf16 in (in, out) layout."""
    w = w_torch_layout.T.astype(jnp.float32)  # (in, out)
    wp = jnp.zeros((PAD, PAD), jnp.float32).at[: w.shape[0], : w.shape[1]].set(w)
    return wp.astype(jnp.bfloat16)


def _pad_bias(b):
    """(out,) bias -> zero-padded (1, PAD) f32 (broadcasts along the sublane axis)."""
    return jnp.zeros((1, PAD), jnp.float32).at[0, : b.shape[0]].set(
        b.astype(jnp.float32))


@functools.partial(jax.jit, static_argnames=("tile_b",))
def dqn_forward(x, params, *, tile_b=DEFAULT_TILE_B):
    """x: [B, INPUT_LAYER] float32. params: dict of PyTorch-layout (out, in) weights."""
    B, f_in = x.shape
    assert f_in == INPUT_LAYER

    # Batch tile: multiple of 8, no larger than the (rounded-up) batch.
    tile_b = max(8, min(tile_b, _round_up(B, 8)))
    b_pad = _round_up(B, tile_b)

    # Zero-pad + cast activations once in the wrapper (bf16 halves the x DMA).
    x_p = jnp.zeros((b_pad, PAD), jnp.bfloat16)
    x_p = x_p.at[:B, :INPUT_LAYER].set(x.astype(jnp.bfloat16))

    w1, w2, w3, w4 = (_pad_weight(params[f"w{i}"]) for i in range(1, 5))
    b1, b2, b3, b4 = (_pad_bias(params[f"b{i}"]) for i in range(1, 5))

    grid = (b_pad // tile_b,)

    act_spec = pl.BlockSpec((tile_b, PAD), lambda i: (i, 0))
    # Constant index maps: weights / biases are fetched once and stay VMEM-resident.
    w_spec = pl.BlockSpec((PAD, PAD), lambda i: (0, 0))
    b_spec = pl.BlockSpec((1, PAD), lambda i: (0, 0))

    out_p = pl.pallas_call(
        _dqn_kernel,
        out_shape=jax.ShapeDtypeStruct((b_pad, PAD), jnp.float32),
        grid=grid,
        in_specs=[act_spec,
                  w_spec, b_spec,
                  w_spec, b_spec,
                  w_spec, b_spec,
                  w_spec, b_spec],
        out_specs=act_spec,
        compiler_params=pltpu.CompilerParams(
            dimension_semantics=("parallel",)),  # v7x: shard batch over both TCs
    )(x_p, w1, b1, w2, b2, w3, b3, w4, b4)

    # Drop batch padding rows and feature padding columns (padded cols are exactly 0).
    return out_p[:B, :OUTPUT_LAYER]


def init_params(key):
    """Deterministic init mimicking nn.Linear's uniform(-1/sqrt(fan_in), +1/sqrt(fan_in))."""
    dims = (INPUT_LAYER,) + HIDDEN_LAYERS + (OUTPUT_LAYER,)
    params = {}
    for i, (fan_in, fan_out) in enumerate(zip(dims[:-1], dims[1:]), start=1):
        key, kw, kb = jax.random.split(key, 3)
        bound = 1.0 / jnp.sqrt(jnp.float32(fan_in))
        # PyTorch layout: weight is (out_features, in_features)
        params[f"w{i}"] = jax.random.uniform(
            kw, (fan_out, fan_in), jnp.float32, minval=-bound, maxval=bound)
        params[f"b{i}"] = jax.random.uniform(
            kb, (fan_out,), jnp.float32, minval=-bound, maxval=bound)
    return params


def _reference_forward(x, params):
    """Pure-f32 JAX reference matching the PyTorch module semantics."""
    h = jnp.maximum(x @ params["w1"].T + params["b1"], 0.0)
    h = jnp.maximum(h @ params["w2"].T + params["b2"], 0.0)
    h = jnp.maximum(h @ params["w3"].T + params["b3"], 0.0)
    return h @ params["w4"].T + params["b4"]


if __name__ == "__main__":
    key = jax.random.PRNGKey(0)
    kp, kx = jax.random.split(key)

    params = init_params(kp)

    # Small deterministic test: batch=8 (single grid step).
    batch = 8
    x = jax.random.normal(kx, (batch, INPUT_LAYER), jnp.float32)

    out = dqn_forward(x, params)
    out = jax.block_until_ready(out)
    ref = _reference_forward(x, params)
    assert out.shape == (batch, OUTPUT_LAYER)
    # bf16 matmul inputs with f32 accumulation -> compare at bf16-level tolerance.
    assert jnp.allclose(out, ref, atol=5e-2, rtol=5e-2), "mismatch vs JAX reference"

    # Second check: batch not a multiple of 8 exercises the padding / slicing path.
    batch2 = 20
    x2 = jax.random.normal(jax.random.PRNGKey(1), (batch2, INPUT_LAYER), jnp.float32)
    out2 = jax.block_until_ready(dqn_forward(x2, params))
    ref2 = _reference_forward(x2, params)
    assert out2.shape == (batch2, OUTPUT_LAYER)
    assert jnp.allclose(out2, ref2, atol=5e-2, rtol=5e-2), "mismatch on padded batch"

    print("KERNEL_OK")
</pallas_src>

<mosaic_0001>
module attributes {stable_mosaic.version = 11 : i64} {
  func.func @_dqn_kernel(%arg0: i32, %arg1: memref<8x128xbf16, #tpu.memory_space<vmem>>, %arg2: memref<128x128xbf16, #tpu.memory_space<vmem>>, %arg3: memref<1x128xf32, #tpu.memory_space<vmem>>, %arg4: memref<128x128xbf16, #tpu.memory_space<vmem>>, %arg5: memref<1x128xf32, #tpu.memory_space<vmem>>, %arg6: memref<128x128xbf16, #tpu.memory_space<vmem>>, %arg7: memref<1x128xf32, #tpu.memory_space<vmem>>, %arg8: memref<128x128xbf16, #tpu.memory_space<vmem>>, %arg9: memref<1x128xf32, #tpu.memory_space<vmem>>, %arg10: memref<8x128xf32, #tpu.memory_space<vmem>>) attributes {dimension_semantics = [#tpu.dimension_semantics<parallel>], iteration_bounds = array<i64: 1>, scalar_prefetch = 0 : i64, scratch_operands = 0 : i64, tpu.core_type = #tpu.core_type<tc>, window_params = [{transform_indices = @transform_0, window_bounds = array<i64: 8, 128>}, {pipeline_mode = #tpu.pipeline_mode<synchronous>, transform_indices = @transform_1, window_bounds = array<i64: 128, 128>}, {pipeline_mode = #tpu.pipeline_mode<synchronous>, transform_indices = @transform_2, window_bounds = array<i64: 1, 128>}, {pipeline_mode = #tpu.pipeline_mode<synchronous>, transform_indices = @transform_3, window_bounds = array<i64: 128, 128>}, {pipeline_mode = #tpu.pipeline_mode<synchronous>, transform_indices = @transform_4, window_bounds = array<i64: 1, 128>}, {pipeline_mode = #tpu.pipeline_mode<synchronous>, transform_indices = @transform_5, window_bounds = array<i64: 128, 128>}, {pipeline_mode = #tpu.pipeline_mode<synchronous>, transform_indices = @transform_6, window_bounds = array<i64: 1, 128>}, {pipeline_mode = #tpu.pipeline_mode<synchronous>, transform_indices = @transform_7, window_bounds = array<i64: 128, 128>}, {pipeline_mode = #tpu.pipeline_mode<synchronous>, transform_indices = @transform_8, window_bounds = array<i64: 1, 128>}, {transform_indices = @transform_9, window_bounds = array<i64: 8, 128>}]} {
    %c0 = arith.constant 0 : index
    %c0_0 = arith.constant 0 : index
    %0 = vector.load %arg1[%c0, %c0_0] : memref<8x128xbf16, #tpu.memory_space<vmem>>, vector<8x128xbf16>
    %c0_1 = arith.constant 0 : index
    %c0_2 = arith.constant 0 : index
    %1 = vector.load %arg2[%c0_1, %c0_2] : memref<128x128xbf16, #tpu.memory_space<vmem>>, vector<128x128xbf16>
    %cst = arith.constant dense<0.000000e+00> : vector<8x128xf32>
    %2 = tpu.matmul %0, %1, %cst {dimension_numbers = #tpu.dot_dimension_numbers<[1], [0], [0], [1], [0, 0, 1, 1], [], []>} : vector<8x128xbf16>, vector<128x128xbf16>, vector<8x128xf32> -> vector<8x128xf32>
    %c0_3 = arith.constant 0 : index
    %c0_4 = arith.constant 0 : index
    %3 = vector.load %arg3[%c0_3, %c0_4] : memref<1x128xf32, #tpu.memory_space<vmem>>, vector<1x128xf32>
    %4 = vector.broadcast %3 : vector<1x128xf32> to vector<8x128xf32>
    %5 = arith.addf %2, %4 : vector<8x128xf32>
    %cst_5 = arith.constant 0.000000e+00 : f32
    %6 = vector.broadcast %cst_5 : f32 to vector<8x128xf32>
    %7 = arith.maximumf %5, %6 : vector<8x128xf32>
    %8 = arith.truncf %7 : vector<8x128xf32> to vector<8x128xbf16>
    %c0_6 = arith.constant 0 : index
    %c0_7 = arith.constant 0 : index
    %9 = vector.load %arg4[%c0_6, %c0_7] : memref<128x128xbf16, #tpu.memory_space<vmem>>, vector<128x128xbf16>
    %cst_8 = arith.constant dense<0.000000e+00> : vector<8x128xf32>
    %10 = tpu.matmul %8, %9, %cst_8 {dimension_numbers = #tpu.dot_dimension_numbers<[1], [0], [0], [1], [0, 0, 1, 1], [], []>} : vector<8x128xbf16>, vector<128x128xbf16>, vector<8x128xf32> -> vector<8x128xf32>
    %c0_9 = arith.constant 0 : index
    %c0_10 = arith.constant 0 : index
    %11 = vector.load %arg5[%c0_9, %c0_10] : memref<1x128xf32, #tpu.memory_space<vmem>>, vector<1x128xf32>
    %12 = vector.broadcast %11 : vector<1x128xf32> to vector<8x128xf32>
    %13 = arith.addf %10, %12 : vector<8x128xf32>
    %cst_11 = arith.constant 0.000000e+00 : f32
    %14 = vector.broadcast %cst_11 : f32 to vector<8x128xf32>
    %15 = arith.maximumf %13, %14 : vector<8x128xf32>
    %16 = arith.truncf %15 : vector<8x128xf32> to vector<8x128xbf16>
    %c0_12 = arith.constant 0 : index
    %c0_13 = arith.constant 0 : index
    %17 = vector.load %arg6[%c0_12, %c0_13] : memref<128x128xbf16, #tpu.memory_space<vmem>>, vector<128x128xbf16>
    %cst_14 = arith.constant dense<0.000000e+00> : vector<8x128xf32>
    %18 = tpu.matmul %16, %17, %cst_14 {dimension_numbers = #tpu.dot_dimension_numbers<[1], [0], [0], [1], [0, 0, 1, 1], [], []>} : vector<8x128xbf16>, vector<128x128xbf16>, vector<8x128xf32> -> vector<8x128xf32>
    %c0_15 = arith.constant 0 : index
    %c0_16 = arith.constant 0 : index
    %19 = vector.load %arg7[%c0_15, %c0_16] : memref<1x128xf32, #tpu.memory_space<vmem>>, vector<1x128xf32>
    %20 = vector.broadcast %19 : vector<1x128xf32> to vector<8x128xf32>
    %21 = arith.addf %18, %20 : vector<8x128xf32>
    %cst_17 = arith.constant 0.000000e+00 : f32
    %22 = vector.broadcast %cst_17 : f32 to vector<8x128xf32>
    %23 = arith.maximumf %21, %22 : vector<8x128xf32>
    %24 = arith.truncf %23 : vector<8x128xf32> to vector<8x128xbf16>
    %c0_18 = arith.constant 0 : index
    %c0_19 = arith.constant 0 : index
    %25 = vector.load %arg8[%c0_18, %c0_19] : memref<128x128xbf16, #tpu.memory_space<vmem>>, vector<128x128xbf16>
    %cst_20 = arith.constant dense<0.000000e+00> : vector<8x128xf32>
    %26 = tpu.matmul %24, %25, %cst_20 {dimension_numbers = #tpu.dot_dimension_numbers<[1], [0], [0], [1], [0, 0, 1, 1], [], []>} : vector<8x128xbf16>, vector<128x128xbf16>, vector<8x128xf32> -> vector<8x128xf32>
    %c0_21 = arith.constant 0 : index
    %c0_22 = arith.constant 0 : index
    %27 = vector.load %arg9[%c0_21, %c0_22] : memref<1x128xf32, #tpu.memory_space<vmem>>, vector<1x128xf32>
    %28 = vector.broadcast %27 : vector<1x128xf32> to vector<8x128xf32>
    %29 = arith.addf %26, %28 : vector<8x128xf32>
    %c0_23 = arith.constant 0 : index
    %c0_24 = arith.constant 0 : index
    %30 = vector.load %arg10[%c0_23, %c0_24] : memref<8x128xf32, #tpu.memory_space<vmem>>, vector<8x128xf32>
    tpu.vector_store %arg10[%c0_23, %c0_24], %29 {strides = array<i32>} : memref<8x128xf32, #tpu.memory_space<vmem>>, vector<8x128xf32>,
    return
  }
  func.func @transform_0(%arg0: i32) -> (i32, i32) {
    %c0_i32 = arith.constant 0 : i32
    %c0_i32_0 = arith.constant 0 : i32
    return %arg0, %c0_i32 : i32, i32
  }
  func.func @transform_1(%arg0: i32) -> (i32, i32) {
    %c0_i32 = arith.constant 0 : i32
    %c0_i32_0 = arith.constant 0 : i32
    %c0_i32_1 = arith.constant 0 : i32
    return %c0_i32, %c0_i32_0 : i32, i32
  }
  func.func @transform_2(%arg0: i32) -> (i32, i32) {
    %c0_i32 = arith.constant 0 : i32
    %c0_i32_0 = arith.constant 0 : i32
    %c0_i32_1 = arith.constant 0 : i32
    return %c0_i32, %c0_i32_0 : i32, i32
  }
  func.func @transform_3(%arg0: i32) -> (i32, i32) {
    %c0_i32 = arith.constant 0 : i32
    %c0_i32_0 = arith.constant 0 : i32
    %c0_i32_1 = arith.constant 0 : i32
    return %c0_i32, %c0_i32_0 : i32, i32
  }
  func.func @transform_4(%arg0: i32) -> (i32, i32) {
    %c0_i32 = arith.constant 0 : i32
    %c0_i32_0 = arith.constant 0 : i32
    %c0_i32_1 = arith.constant 0 : i32
    return %c0_i32, %c0_i32_0 : i32, i32
  }
  func.func @transform_5(%arg0: i32) -> (i32, i32) {
    %c0_i32 = arith.constant 0 : i32
    %c0_i32_0 = arith.constant 0 : i32
    %c0_i32_1 = arith.constant 0 : i32
    return %c0_i32, %c0_i32_0 : i32, i32
  }
  func.func @transform_6(%arg0: i32) -> (i32, i32) {
    %c0_i32 = arith.constant 0 : i32
    %c0_i32_0 = arith.constant 0 : i32
    %c0_i32_1 = arith.constant 0 : i32
    return %c0_i32, %c0_i32_0 : i32, i32
  }
  func.func @transform_7(%arg0: i32) -> (i32, i32) {
    %c0_i32 = arith.constant 0 : i32
    %c0_i32_0 = arith.constant 0 : i32
    %c0_i32_1 = arith.constant 0 : i32
    return %c0_i32, %c0_i32_0 : i32, i32
  }
  func.func @transform_8(%arg0: i32) -> (i32, i32) {
    %c0_i32 = arith.constant 0 : i32
    %c0_i32_0 = arith.constant 0 : i32
    %c0_i32_1 = arith.constant 0 : i32
    return %c0_i32, %c0_i32_0 : i32, i32
  }
  func.func @transform_9(%arg0: i32) -> (i32, i32) {
    %c0_i32 = arith.constant 0 : i32
    %c0_i32_0 = arith.constant 0 : i32
    return %arg0, %c0_i32 : i32, i32
  }
}

</mosaic_0001>

<bundles_post_ra>
// kernel: dqn_forward.1
= control target key start
LH: loop header
LB: loop body
LE: loop exit
PB: predicated region body
PF: predicated region fallthrough
CT: control target
= control target key end

     0   :  { %s737_s0 = inlined_call_operand.vmem [shape: bf16[8,128], index: 0, kind: input, shape index: {}]   ;;  %s738_s1 = inlined_call_operand.vmem [shape: bf16[128,128], index: 1, kind: input, shape index: {}]   ;;  %s739_s2 = inlined_call_operand.vmem [shape: f32[1,128], index: 2, kind: input, shape index: {}]   ;;  %s740_s3 = inlined_call_operand.vmem [shape: bf16[128,128], index: 3, kind: input, shape index: {}]   ;;  %s741_s4 = inlined_call_operand.vmem [shape: f32[1,128], index: 4, kind: input, shape index: {}]   ;;  %s742_s5 = inlined_call_operand.vmem [shape: bf16[128,128], index: 5, kind: input, shape index: {}]   ;;  %s743_s6 = inlined_call_operand.vmem [shape: f32[1,128], index: 6, kind: input, shape index: {}]   ;;  %s744_s7 = inlined_call_operand.vmem [shape: bf16[128,128], index: 7, kind: input, shape index: {}]   ;;  %s745_s8 = inlined_call_operand.vmem [shape: f32[1,128], index: 8, kind: input, shape index: {}]   ;;  %s746_s9 = inlined_call_operand.hbm [shape: f32[8,128], index: 9, kind: output, shape index: {}]  }
   0x1   :  { %v516_v0 = vld [vmem:[%s738_s1 + $0x38] sm:$0xff]  ;;  %v515_v1 = vld [vmem:[%s738_s1 + $0x30] sm:$0xff]  ;;  %v514_v3 = vld [vmem:[%s738_s1 + $0x28] sm:$0xff] }
   0x2   :  { %102 = vmatpush.bf16.msra.mxu0 %v516_v0  ;;  %v524_v2 = vld [vmem:[%s740_s3 + $0x38] sm:$0xff]  ;;  %v523_v4 = vld [vmem:[%s740_s3 + $0x30] sm:$0xff] }
   0x3   :  { %185 = vmatpush.bf16.msra.mxu1 %v524_v2 }
   0x6   :  { %103 = vmatpush.bf16.msra.mxu0 %v515_v1 }
   0x7   :  { %14 = vsyncpa [#allocation3], 0  ;;  %186 = vmatpush.bf16.msra.mxu1 %v523_v4  ;;  %v522_v5 = vld [vmem:[%s740_s3 + $0x28] sm:$0xff]  ;;  %v513_v6 = vld [vmem:[%s738_s1 + $0x20] sm:$0xff]  ;;  %s572_s11 = smov [#allocation2]  }
   0x8   :  { %v521_v7 = vld [vmem:[%s740_s3 + $0x20] sm:$0xff]  ;;  %v512_v8 = vld [vmem:[%s738_s1 + $0x18] sm:$0xff]  ;;  %v511_v10 = vld [vmem:[%s738_s1 + $0x10] sm:$0xff]  ;;  %s370_s12 = sshll.u32 %s572_s11, 4  ;;  %s371_s12 = int_to_ptr.vmem [resolvable:$true] %s370_s12 }
   0x9   :  { %v520_v9 = vld [vmem:[%s740_s3 + $0x18] sm:$0xff]  ;;  %v519_v11 = vld [vmem:[%s740_s3 + $0x10] sm:$0xff]  ;;  %v510_v12 = vld [vmem:[%s738_s1 + $0x8] sm:$0xff] }
   0xa   :  { %104 = vmatpush.bf16.msra.mxu0 %v514_v3  ;;  %v509_v13 = vld [vmem:[%s738_s1] sm:$0xff]  ;;  %v518_v15 = vld [vmem:[%s740_s3 + $0x8] sm:$0xff]  ;;  %v532_v17 = vld [vmem:[%s742_s5 + $0x38] sm:$0xff] }
   0xb   :  { %187 = vmatpush.bf16.msra.mxu1 %v522_v5  ;;  %v33_v14 = vld [vmem:[%s737_s0] sm:$0xf]  ;;  %268 = vmatpush.bf16.msra.mxu2 %v532_v17  ;;  %v531_v18 = vld [vmem:[%s742_s5 + $0x30] sm:$0xff]  ;;  %v530_v19 = vld [vmem:[%s742_s5 + $0x28] sm:$0xff] }
   0xc   :  { %v517_v16 = vld [vmem:[%s740_s3] sm:$0xff]  ;;  %v528_v21 = vld [vmem:[%s742_s5 + $0x18] sm:$0xff]  ;;  %v527_v22 = vld [vmem:[%s742_s5 + $0x10] sm:$0xff] }
   0xd   :  { %v529_v20 = vld [vmem:[%s742_s5 + $0x20] sm:$0xff]  ;;  %v526_v29 = vld [vmem:[%s742_s5 + $0x8] sm:$0xff]  ;;  %v540_v31 = vld [vmem:[%s744_s7 + $0x38] sm:$0xff] }
   0xe   :  { %105 = vmatpush.bf16.msra.mxu0 %v513_v6  ;;  %v542_v23 = vld [vmem:[%s739_s2] ss:$0 sm:$0xff]  ;;  %351 = vmatpush.bf16.msra.mxu3 %v540_v31  ;;  %v539_v32 = vld [vmem:[%s744_s7 + $0x30] sm:$0xff]  ;;  %v538_v33 = vld [vmem:[%s744_s7 + $0x28] sm:$0xff] }
   0xf   :  { %188 = vmatpush.bf16.msra.mxu1 %v521_v7  ;;  %269 = vmatpush.bf16.msra.mxu2 %v531_v18  ;;  %v525_v30 = vld [vmem:[%s742_s5] sm:$0xff]  ;;  %v536_v35 = vld [vmem:[%s744_s7 + $0x18] sm:$0xff]  ;;  %v535_v36 = vld [vmem:[%s744_s7 + $0x10] sm:$0xff] }
  0x10   :  { %v537_v34 = vld [vmem:[%s744_s7 + $0x20] sm:$0xff]  ;;  %v534_v43 = vld [vmem:[%s744_s7 + $0x8] sm:$0xff] }
  0x11   :  { %v543_v37 = vld [vmem:[%s741_s4] ss:$0 sm:$0xff] }
  0x12   :  { %106 = vmatpush.bf16.msra.mxu0 %v512_v8  ;;  %352 = vmatpush.bf16.msra.mxu3 %v539_v32  ;;  %v533_v44 = vld [vmem:[%s744_s7] sm:$0xff]  ;;  %s372_s7 = sshll.u32 %s746_s9, 4  ;;  %s373_s7 = int_to_ptr.hbm [resolvable:$true] %s372_s7 }
  0x13   :  { %189 = vmatpush.bf16.msra.mxu1 %v520_v9  ;;  %270 = vmatpush.bf16.msra.mxu2 %v530_v19  ;;  %v544_v45 = vld [vmem:[%s743_s6] ss:$0 sm:$0xff] }
  0x14   :  { %v545_v51 = vld [vmem:[%s745_s8] ss:$0 sm:$0xff] }
  0x16   :  { %107 = vmatpush.bf16.msra.mxu0 %v511_v10  ;;  %353 = vmatpush.bf16.msra.mxu3 %v538_v33 }
  0x17   :  { %190 = vmatpush.bf16.msra.mxu1 %v519_v11  ;;  %271 = vmatpush.bf16.msra.mxu2 %v529_v20 }
  0x1a   :  { %108 = vmatpush.bf16.msra.mxu0 %v510_v12  ;;  %354 = vmatpush.bf16.msra.mxu3 %v537_v34 }
  0x1b   :  { %191 = vmatpush.bf16.msra.mxu1 %v518_v15  ;;  %272 = vmatpush.bf16.msra.mxu2 %v528_v21 }
  0x1e   :  { %109 = vmatpush.bf16.msra.mxu0 %v509_v13  ;;  %355 = vmatpush.bf16.msra.mxu3 %v536_v35 }
  0x1f   :  { %192 = vmatpush.bf16.msra.mxu1 %v517_v16  ;;  %273 = vmatpush.bf16.msra.mxu2 %v527_v22 }
  0x21   :  { %110 = vmatmul.bf16.vlgmr.msra.gmra.mxu0 %v33_v14 }
  0x22   :  { %356 = vmatpush.bf16.msra.mxu3 %v535_v36 }
  0x23   :  { %274 = vmatpush.bf16.msra.mxu2 %v526_v29 }
  0x26   :  { %357 = vmatpush.bf16.msra.mxu3 %v534_v43 }
  0x27   :  { %275 = vmatpush.bf16.msra.mxu2 %v525_v30 }
  0x2a   :  { %358 = vmatpush.bf16.msra.mxu3 %v533_v44 }
  0x9e   :  { %v111_v24 = vpop.f32.mrf.mxu0 }
  0x9f   :  { %v112_v25 = vadd.f32 %v542_v23, %v111_v24 }
  0xa1   :  { %v115_v26 = vmax.f32 %v112_v25, 0.0 }
  0xa3   :  { %v116_v27 = vpack.c.bf16 %v115_v26, %v115_v26 }
  0xa5   :  { %193 = vmatmul.bf16.vlgmr.msra.gmra.mxu1 %v116_v27 }
  0xa6   :  { %v113_v28 = vpop.f32.mrf.mxu0 }
 0x122   :  { %v194_v38 = vpop.f32.mrf.mxu1 }
 0x123   :  { %v195_v39 = vadd.f32 %v543_v37, %v194_v38 }
 0x125   :  { %v198_v40 = vmax.f32 %v195_v39, 0.0 }
 0x127   :  { %v199_v41 = vpack.c.bf16 %v198_v40, %v198_v40 }
 0x129   :  { %276 = vmatmul.bf16.vlgmr.msra.gmra.mxu2 %v199_v41 }
 0x12a   :  { %v196_v42 = vpop.f32.mrf.mxu1 }
 0x1ac   :  { %v277_v46 = vpop.f32.mrf.mxu2 }
 0x1ad   :  { %v278_v47 = vadd.f32 %v544_v45, %v277_v46 }
 0x1af   :  { %v281_v48 = vmax.f32 %v278_v47, 0.0 }
 0x1b1   :  { %v282_v49 = vpack.c.bf16 %v281_v48, %v281_v48 }
 0x1b3   :  { %359 = vmatmul.bf16.vlgmr.msra.gmra.mxu3 %v282_v49 }
 0x1b4   :  { %v279_v50 = vpop.f32.mrf.mxu2 }
 0x236   :  { %v360_v52 = vpop.f32.mrf.mxu3 }
 0x237   :  { %v361_v53 = vadd.f32 %v545_v51, %v360_v52 }
 0x239   :  { %364 = vst [vmem:[#allocation2] sm:$0xff] %v361_v53 }
 0x23a   :  { %375 = dma.vmem_to_hbm [thread:$0]  %s371_s12, 128, %s373_s7, [#allocation3]  }
 0x23e   :  { %v362_v54 = vpop.f32.mrf.mxu3 }
 0x23f   :  { %570 = dma.done.wait [#allocation3], 128  }
 0x240   :  { %571 = vsyncadd [#allocation3], 4294967168 }
 0x241   :  { %380 = vsyncpa [#allocation3], 1 }

</bundles_post_ra>
